<compile_context>
chip_gen: v7x
topology: tpu7x:2x2x1
jax: 0.10.0
libtpu: 0.0.40
codegen_flags: <defaults>
</compile_context>

<pallas_src>
import functools

import jax
import jax.numpy as jnp
from jax.experimental import pallas as pl
from jax.experimental.pallas import tpu as pltpu


# --------------------------------------------------------------------------
# Kernel
# --------------------------------------------------------------------------
def _ffn_kernel(x_ref, w13_ref, w2_ref, o_ref, acc_ref, *, block_h):
    """One (row-tile i, hidden-tile j) step of y = (silu(x@W1) * (x@W3)) @ W2.

    w13_ref holds the fused [W1_j | W3_j] column block for hidden tile j, so
    the gate/up path is a single MXU matmul whose result is sliced in VMEM.
    """
    j = pl.program_id(1)

    @pl.when(j == 0)
    def _init():
        acc_ref[...] = jnp.zeros_like(acc_ref)

    x = x_ref[...]                                                     # (tm, dim) bf16
    h = jnp.dot(x, w13_ref[...], preferred_element_type=jnp.float32)   # (tm, 2*th) f32
    h1 = h[:, :block_h]
    h3 = h[:, block_h:]

    # silu(h1) * h3 in f32; exp + approximate reciprocal sit on the EUP slot.
    # (f32 keeps exp(-h1) from overflowing until h1 < ~-88, where recip(inf)=0
    #  gives the correct silu limit.)
    g = h1 * pl.reciprocal(1.0 + jnp.exp(-h1), approx=True) * h3

    # Partial contraction over this hidden tile, accumulated in f32.
    acc_ref[...] += jnp.dot(g.astype(w2_ref.dtype), w2_ref[...],
                            preferred_element_type=jnp.float32)

    @pl.when(j == pl.num_programs(1) - 1)
    def _finalize():
        o_ref[...] = acc_ref[...].astype(o_ref.dtype)


# --------------------------------------------------------------------------
# Tile selection / weight preparation (done once at model init)
# --------------------------------------------------------------------------
def _pick_block(n, target, align):
    """Largest b <= min(target, n) with n % b == 0 and (b % align == 0 or b == n)."""
    t = min(target, n)
    for c in range(t, 0, -1):
        if n % c == 0 and (c % align == 0 or c == n):
            return c
    return n


def select_tiles(S, hidden):
    """Device-aware (block_m, block_h).  block_m is the arithmetic-intensity knob."""
    try:
        kind = jax.devices()[0].device_kind.lower()
    except Exception:
        kind = ""
    if "v5" in kind:
        bm_target, bh_target = 384, 256     # roofline ~240 flops/byte
    elif "v7" in kind:
        bm_target, bh_target = 512, 512     # 64 MiB VMEM, ~310 flops/byte
    else:                                   # v6e and default
        bm_target, bh_target = 768, 512     # 128 MiB VMEM, ~680 flops/byte

    block_m = _pick_block(S, bm_target, 8)
    # Keep >= 2 row tiles so the "parallel" axis shards across both TCs (v7x).
    while S // block_m < 2 and block_m % 16 == 0:
        block_m //= 2
    block_h = _pick_block(hidden, bh_target, 128)
    return block_m, block_h


def prepare_ffn_weights(w1, w2, w3, *, block_h, compute_dtype=jnp.bfloat16):
    """Fuse W1/W3 (interleaved per hidden tile) and cast weights ONCE.

    Returns (w13, w2c):
      w13 : (dim, 2*hidden) where columns [j*2*bh : j*2*bh+bh] = W1 tile j and
            the following bh columns = W3 tile j.
      w2c : (hidden, dim) in compute dtype.
    """
    dim, hidden = w1.shape
    assert w3.shape == (dim, hidden) and w2.shape == (hidden, dim)
    assert hidden % block_h == 0
    n = hidden // block_h
    w1r = w1.reshape(dim, n, block_h)
    w3r = w3.reshape(dim, n, block_h)
    w13 = jnp.concatenate([w1r, w3r], axis=2).reshape(dim, 2 * hidden)
    return w13.astype(compute_dtype), w2.astype(compute_dtype)


# --------------------------------------------------------------------------
# Forward pass
# --------------------------------------------------------------------------
def feedforward_forward(x, w13, w2, *, block_m, block_h,
                        compute_dtype=jnp.bfloat16, out_dtype=jnp.bfloat16):
    """y = (silu(x @ W1) * (x @ W3)) @ W2 with pre-fused, pre-cast weights."""
    S, dim = x.shape
    hidden = w2.shape[0]
    assert w13.shape == (dim, 2 * hidden)
    assert w2.shape == (hidden, dim)
    assert S % block_m == 0, "row count must divide into block_m tiles"
    assert hidden % block_h == 0, "hidden_dim must divide into block_h tiles"

    xc = x.astype(compute_dtype)          # activations only; weights pre-cast.
    out_bytes = jnp.dtype(out_dtype).itemsize
    n_row_tiles = S // block_m

    # VMEM budget: double-buffered x / w13 / w2 / out tiles + f32 accumulator.
    bpe = jnp.dtype(compute_dtype).itemsize
    vmem_est = (block_m * dim * bpe * 2
                + dim * (2 * block_h) * bpe * 2
                + block_h * dim * bpe * 2
                + block_m * dim * out_bytes * 2
                + block_m * dim * 4)
    vmem_limit = min(max(32 << 20, int(vmem_est * 1.25) + (2 << 20)), 100 << 20)

    cost = pl.CostEstimate(
        flops=6 * S * dim * hidden,
        transcendentals=S * hidden,
        bytes_accessed=(S * dim * bpe
                        + n_row_tiles * 3 * dim * hidden * bpe
                        + S * dim * out_bytes),
    )

    grid = (n_row_tiles, hidden // block_h)
    kernel = functools.partial(_ffn_kernel, block_h=block_h)
    return pl.pallas_call(
        kernel,
        out_shape=jax.ShapeDtypeStruct((S, dim), out_dtype),
        grid_spec=pltpu.PrefetchScalarGridSpec(
            num_scalar_prefetch=0,
            grid=grid,
            in_specs=[
                pl.BlockSpec((block_m, dim), lambda i, j: (i, 0)),       # x row tile
                pl.BlockSpec((dim, 2 * block_h), lambda i, j: (0, j)),   # fused [W1|W3] tile
                pl.BlockSpec((block_h, dim), lambda i, j: (j, 0)),       # W2 row tile
            ],
            out_specs=pl.BlockSpec((block_m, dim), lambda i, j: (i, 0)),
            scratch_shapes=[pltpu.VMEM((block_m, dim), jnp.float32)],
        ),
        compiler_params=pltpu.CompilerParams(
            dimension_semantics=("parallel", "arbitrary"),
            vmem_limit_bytes=vmem_limit,
        ),
        cost_estimate=cost,
    )(xc, w13, w2)


def reference_forward(x, w1, w2, w3):
    """Pure-JAX replica of the PyTorch forward: w2(silu(w1(x)) * w3(x))."""
    h1 = x @ w1
    h3 = x @ w3
    return (h1 * jax.nn.sigmoid(h1) * h3) @ w2


# --------------------------------------------------------------------------
# Self-test (small shapes)
# --------------------------------------------------------------------------
if __name__ == "__main__":
    # Small ModelArgs-consistent shapes (dim, hidden_dim); S = flattened tokens.
    S, dim, hidden = 256, 128, 256

    key0 = jax.random.PRNGKey(0)
    kx, k1, k2, k3 = jax.random.split(key0, 4)
    x = jax.random.normal(kx, (S, dim), dtype=jnp.float32)
    # nn.Linear(in, out, bias=False) weights, stored transposed as (in, out).
    w1 = jax.random.normal(k1, (dim, hidden), dtype=jnp.float32) * 0.05
    w2 = jax.random.normal(k2, (hidden, dim), dtype=jnp.float32) * 0.05
    w3 = jax.random.normal(k3, (dim, hidden), dtype=jnp.float32) * 0.05

    block_m, block_h = select_tiles(S, hidden)
    # One-time weight prep (fuse W1/W3 per hidden tile, cast to bf16).
    w13_c, w2_c = prepare_ffn_weights(w1, w2, w3, block_h=block_h)

    out = feedforward_forward(x, w13_c, w2_c, block_m=block_m, block_h=block_h)
    out = jax.block_until_ready(out)

    ref = reference_forward(x, w1, w2, w3)
    assert out.shape == (S, dim)
    out_f32 = out.astype(jnp.float32)
    max_err = jnp.max(jnp.abs(out_f32 - ref))
    # bf16 compute + approximate-reciprocal sigmoid -> loose tolerance.
    assert jnp.allclose(out_f32, ref, rtol=2e-2, atol=2e-2), (
        f"max abs err = {max_err}")
    print("KERNEL_OK")
</pallas_src>

<mosaic_0001>
module attributes {stable_mosaic.version = 11 : i64} {
  func.func @_ffn_kernel(%arg0: i32, %arg1: i32, %arg2: memref<128x128xbf16, #tpu.memory_space<vmem>>, %arg3: memref<128x512xbf16, #tpu.memory_space<vmem>>, %arg4: memref<256x128xbf16, #tpu.memory_space<vmem>>, %arg5: memref<128x128xbf16, #tpu.memory_space<vmem>>, %arg6: memref<128x128xf32, #tpu.memory_space<vmem>>) attributes {dimension_semantics = [#tpu.dimension_semantics<parallel>, #tpu.dimension_semantics<arbitrary>], iteration_bounds = array<i64: 2, 1>, scalar_prefetch = 0 : i64, scratch_operands = 1 : i64, tpu.core_type = #tpu.core_type<tc>, window_params = [{transform_indices = @transform_0, window_bounds = array<i64: 128, 128>}, {transform_indices = @transform_1, window_bounds = array<i64: 128, 512>}, {transform_indices = @transform_2, window_bounds = array<i64: 256, 128>}, {transform_indices = @transform_3, window_bounds = array<i64: 128, 128>}]} {
    %c0_i32 = arith.constant 0 : i32
    %0 = arith.cmpi eq, %arg1, %c0_i32 : i32
    %1 = arith.extui %0 : i1 to i32
    %c0_i32_0 = arith.constant 0 : i32
    %2 = arith.cmpi ne, %1, %c0_i32_0 : i32
    scf.if %2 {
      %cst_15 = arith.constant 0.000000e+00 : f32
      %25 = vector.broadcast %cst_15 : f32 to vector<128x128xf32>
      %c0_16 = arith.constant 0 : index
      %c0_17 = arith.constant 0 : index
      %26 = vector.load %arg6[%c0_16, %c0_17] : memref<128x128xf32, #tpu.memory_space<vmem>>, vector<128x128xf32>
      tpu.vector_store %arg6[%c0_16, %c0_17], %25 {strides = array<i32>} : memref<128x128xf32, #tpu.memory_space<vmem>>, vector<128x128xf32>,
    } else {
    }
    %c0 = arith.constant 0 : index
    %c0_1 = arith.constant 0 : index
    %3 = vector.load %arg2[%c0, %c0_1] : memref<128x128xbf16, #tpu.memory_space<vmem>>, vector<128x128xbf16>
    %c0_2 = arith.constant 0 : index
    %c0_3 = arith.constant 0 : index
    %4 = vector.load %arg3[%c0_2, %c0_3] : memref<128x512xbf16, #tpu.memory_space<vmem>>, vector<128x512xbf16>
    %cst = arith.constant dense<0.000000e+00> : vector<128x512xf32>
    %5 = tpu.matmul %3, %4, %cst {dimension_numbers = #tpu.dot_dimension_numbers<[1], [0], [0], [1], [0, 0, 1, 1], [], []>} : vector<128x128xbf16>, vector<128x512xbf16>, vector<128x512xf32> -> vector<128x512xf32>
    %6 = vector.extract_strided_slice %5 {offsets = [0, 0], sizes = [128, 256], strides = [1, 1]} : vector<128x512xf32> to vector<128x256xf32>
    %7 = vector.extract_strided_slice %5 {offsets = [0, 256], sizes = [128, 256], strides = [1, 1]} : vector<128x512xf32> to vector<128x256xf32>
    %cst_4 = arith.constant 0.000000e+00 : f32
    %8 = vector.broadcast %cst_4 : f32 to vector<128x256xf32>
    %9 = arith.subf %8, %6 : vector<128x256xf32>
    %10 = math.exp %9 : vector<128x256xf32>
    %cst_5 = arith.constant 1.000000e+00 : f32
    %11 = vector.broadcast %cst_5 : f32 to vector<128x256xf32>
    %12 = arith.addf %11, %10 : vector<128x256xf32>
    %13 = tpu.reciprocal %12 {approx = true} : vector<128x256xf32> -> vector<128x256xf32>
    %14 = arith.mulf %6, %13 : vector<128x256xf32>
    %15 = arith.mulf %14, %7 : vector<128x256xf32>
    %c0_6 = arith.constant 0 : index
    %c0_7 = arith.constant 0 : index
    %16 = vector.load %arg6[%c0_6, %c0_7] : memref<128x128xf32, #tpu.memory_space<vmem>>, vector<128x128xf32>
    %17 = arith.truncf %15 : vector<128x256xf32> to vector<128x256xbf16>
    %c0_8 = arith.constant 0 : index
    %c0_9 = arith.constant 0 : index
    %18 = vector.load %arg4[%c0_8, %c0_9] : memref<256x128xbf16, #tpu.memory_space<vmem>>, vector<256x128xbf16>
    %cst_10 = arith.constant dense<0.000000e+00> : vector<128x128xf32>
    %19 = tpu.matmul %17, %18, %cst_10 {dimension_numbers = #tpu.dot_dimension_numbers<[1], [0], [0], [1], [0, 0, 1, 1], [], []>} : vector<128x256xbf16>, vector<256x128xbf16>, vector<128x128xf32> -> vector<128x128xf32>
    %20 = arith.addf %16, %19 : vector<128x128xf32>
    %c0_11 = arith.constant 0 : index
    %c0_12 = arith.constant 0 : index
    %21 = vector.load %arg6[%c0_11, %c0_12] : memref<128x128xf32, #tpu.memory_space<vmem>>, vector<128x128xf32>
    tpu.vector_store %arg6[%c0_11, %c0_12], %20 {strides = array<i32>} : memref<128x128xf32, #tpu.memory_space<vmem>>, vector<128x128xf32>,
    %c0_i32_13 = arith.constant 0 : i32
    %22 = arith.cmpi eq, %arg1, %c0_i32_13 : i32
    %23 = arith.extui %22 : i1 to i32
    %c0_i32_14 = arith.constant 0 : i32
    %24 = arith.cmpi ne, %23, %c0_i32_14 : i32
    scf.if %24 {
      %c0_15 = arith.constant 0 : index
      %c0_16 = arith.constant 0 : index
      %25 = vector.load %arg6[%c0_15, %c0_16] : memref<128x128xf32, #tpu.memory_space<vmem>>, vector<128x128xf32>
      %26 = arith.truncf %25 : vector<128x128xf32> to vector<128x128xbf16>
      %c0_17 = arith.constant 0 : index
      %c0_18 = arith.constant 0 : index
      %27 = vector.load %arg5[%c0_17, %c0_18] : memref<128x128xbf16, #tpu.memory_space<vmem>>, vector<128x128xbf16>
      tpu.vector_store %arg5[%c0_17, %c0_18], %26 {strides = array<i32>} : memref<128x128xbf16, #tpu.memory_space<vmem>>, vector<128x128xbf16>,
    } else {
    }
    return
  }
  func.func @transform_0(%arg0: i32, %arg1: i32) -> (i32, i32) {
    %c0_i32 = arith.constant 0 : i32
    %c0_i32_0 = arith.constant 0 : i32
    return %arg0, %c0_i32 : i32, i32
  }
  func.func @transform_1(%arg0: i32, %arg1: i32) -> (i32, i32) {
    %c0_i32 = arith.constant 0 : i32
    %c0_i32_0 = arith.constant 0 : i32
    return %c0_i32, %arg1 : i32, i32
  }
  func.func @transform_2(%arg0: i32, %arg1: i32) -> (i32, i32) {
    %c0_i32 = arith.constant 0 : i32
    %c0_i32_0 = arith.constant 0 : i32
    return %arg1, %c0_i32 : i32, i32
  }
  func.func @transform_3(%arg0: i32, %arg1: i32) -> (i32, i32) {
    %c0_i32 = arith.constant 0 : i32
    %c0_i32_0 = arith.constant 0 : i32
    return %arg0, %c0_i32 : i32, i32
  }
}

</mosaic_0001>

<bundles_post_ra>
// kernel: tpu_custom_call.1
= control target key start
LH: loop header
LB: loop body
LE: loop exit
PB: predicated region body
PF: predicated region fallthrough
CT: control target
= control target key end

     0   :  { %8 = vsyncpa [#allocation4], 0  ;;  %s2720_s0 = inlined_call_operand.hbm [shape: bf16[256,128], index: 0, kind: input, shape index: {}]   ;;  %s2721_s1 = inlined_call_operand.hbm [shape: bf16[128,512], index: 1, kind: input, shape index: {}]   ;;  %s2722_s2 = inlined_call_operand.hbm [shape: bf16[256,128], index: 2, kind: input, shape index: {}]   ;;  %s2723_s3 = inlined_call_operand.hbm [shape: bf16[256,128], index: 3, kind: output, shape index: {}]  }
   0x1   :  { %10 = vsyncpa [#allocation4 + $0x1], 0 }
   0x2   :  { %11 = vsyncpa [#allocation7], 0 }
   0x3   :  { %12 = vsyncpa [#allocation5], 0 }
   0x4   :  { %14 = vsyncpa [#allocation5 + $0x1], 0  ;;  %s2214_s12 = smov 0   ;;  %s2216_s13 = smov 0  }
   0x5   :  { %s2218_s14 = smov 0   ;;  %s2220_s15 = smov 0  }
   0x6   :  { %s2222_s16 = smov 0   ;;  %s2224_s17 = smov 0  }
   0x7 LB: > { %s1483_s18 = sadd.s32 4294967295, %s2181_s17   ;;  %s1484_s19 = sadd.s32 4294967294, %s2181_s17   ;;  %s2181_s17 = sphi %s2224_s17, %s20_s17   ;;  %s2177_s16 = sphi %s2222_s16, %s2745_s16   ;;  %s2173_s15 = sphi %s2220_s15, %s2744_s15   ;;  %s2169_s14 = sphi %s2218_s14, %s2743_s14   ;;  %s2165_s13 = sphi %s2216_s13, %s2742_s13   ;;  %s2161_s12 = sphi %s2214_s12, %s2741_s12  }
   0x8   : > { %p52_p0 = scmp.ne.s32.totalorder %s2165_s13, %s2161_s12  ;;  %p2248_p1 = scmp.eq.s32.totalorder %s1483_s18, 0 }
   0x9   : > { %p2252_p2 = scmp.eq.s32.totalorder %s1483_s18, 1  ;;  %p134_p3 = scmp.eq.s32.totalorder %s1484_s19, 1 }
   0xa   : > { %s2728_s20 = scalar_select %p2248_p1, 1, 0 }
   0xb   : > { %p2258_p4 = por %p2248_p1, %p52_p0  ;;  %p1485_p5 = scmp.ge.s32.totalorder %s2181_s17, 1 }
   0xc   : > { %p2263_p6 = por %p134_p3, %p52_p0  ;;  %p141_p7 = scmp.lt.s32.totalorder %s2181_s17, 3 }
   0xd   : > { %s2730_s22 = scalar_select %p2258_p4, 1, 0 }
   0xe   : > { %s2731_s23 = scalar_select %p2263_p6, 1, 0 }
   0xf   : > { %p2268_p8 = pnand %p1485_p5, %p141_p7  ;;  %s2183_s25 = smov [#allocation6]  }
  0x10   : > { %s156_s26 = sshll.u32 %s2183_s25, 4  ;;  %s2184_s28 = smov [#allocation8]   ;;  %s2272_s26 = int_to_ptr.vmem [resolvable:$true] %s156_s26 }
  0x11   : > { %p1731_p9 = pneg %p2268_p8  ;;  %s172_s29 = sshll.u32 %s2184_s28, 4  ;;  %s2283_s29 = int_to_ptr.vmem [resolvable:$true] %s172_s29 }
  0x12   : > { %s2009_s5 = scalar_lea.hbm %s2721_s1, 4096 }
  0x13   : > { %p2279_p11 = pnand %p1731_p9, %p2248_p1  ;;  %p2010_p12 = scmp.ne.s32.totalorder %s2721_s1, %s2009_s5 }
  0x14   : > { %p2016_p5 = scmp.lt.u32.totalorder %s2009_s5, %s2721_s1 }
  0x15   : > { %p2011_p13 = pneg %p2279_p11 }
  0x17   : > { %p2012_p0 = pnand %p2011_p13, %p2010_p12 }
  0x19   : > { %p2013_p3 = pneg %p2012_p0 }
  0x1b   : > { %p2018_p7 = pnand %p2016_p5, %p2013_p3 }
  0x1d   : > { %2021 = shalt.err (!%p2018_p7)
}
  0x1e   : > { %s2022_s10 = scalar_lea.vmem %s2272_s26, 4096  ;;  %p2030_p1 = scmp.lt.s32.totalorder %s2272_s26, %s2272_s26 }
  0x1f   : > { %p2023_p9 = scmp.ne.s32.totalorder %s2272_s26, %s2022_s10  ;;  %p2031_p12 = scmp.lt.s32.totalorder %s2022_s10, %s2022_s10 }
  0x21   : > { %p2025_p10 = pnand %p2023_p9, %p2011_p13  ;;  %p2032_p0 = por %p2031_p12, %p2030_p1 }
  0x23   : > { %p2026_p6 = pneg %p2025_p10 }
  0x25   : > { %p2033_p4 = pnand %p2032_p0, %p2026_p6 }
  0x27   : > { %2036 = shalt.err (!%p2033_p4)
}
  0x28   : > { %s2185_s11 = smov 256   ;;  %s2186_s18 = smov 16  }
  0x29   : > { %1734 = dma.hbm_to_vmem [thread:$0]  (!%p2279_p11), %s2721_s1, 4096, %s2272_s26, [#allocation7], %s2185_s11, %s2185_s11, %s2186_s18  }
  0x2a   : > { %s2037_s4 = scalar_lea.hbm %s2722_s2, 2048 }
  0x2b   : > { %p2038_p1 = scmp.ne.s32.totalorder %s2722_s2, %s2037_s4  ;;  %p2044_p10 = scmp.lt.u32.totalorder %s2037_s4, %s2722_s2 }
  0x2d   : > { %p2040_p4 = pnand %p2038_p1, %p2011_p13 }
  0x2f   : > { %p2041_p6 = pneg %p2040_p4 }
  0x31   : > { %p2046_p3 = pnand %p2044_p10, %p2041_p6 }
  0x33   : > { %2049 = shalt.err (!%p2046_p3)
}
  0x34   : > { %s2050_s26 = scalar_lea.vmem %s2283_s29, 2048  ;;  %p2058_p12 = scmp.lt.s32.totalorder %s2283_s29, %s2283_s29 }
  0x35   : > { %p2051_p5 = scmp.ne.s32.totalorder %s2283_s29, %s2050_s26  ;;  %p2059_p0 = scmp.lt.s32.totalorder %s2050_s26, %s2050_s26 }
  0x37   : > { %p2053_p7 = pnand %p2051_p5, %p2011_p13  ;;  %p2060_p1 = por %p2059_p0, %p2058_p12 }
  0x39   : > { %p2054_p9 = pneg %p2053_p7 }
  0x3b   : > { %p2061_p4 = pnand %p2060_p1, %p2054_p9 }
  0x3d   : > { %2064 = shalt.err (!%p2061_p4)
}
  0x3e   : > { %s2187_s9 = smov 64   ;;  %s2188_s10 = smov 4  }
  0x3f   : > { %1737 = dma.hbm_to_vmem [thread:$0]  (!%p2279_p11), %s2722_s2, 2048, %s2283_s29, [#allocation7], %s2187_s9, %s2187_s9, %s2188_s10  }
  0x40   : > { %s32_s19 = sadd.s32 1, %s2177_s16  ;;  %s39_s25 = sadd.s32 1, %s2169_s14 }
  0x41   : > { %p34_p13 = scmp.ge.s32.totalorder %s32_s19, 2  ;;  %p46_p6 = scmp.ne.s32.totalorder %s2169_s14, %s2165_s13 }
  0x42   : > { %p47_p10 = scmp.eq.s32.totalorder %s2181_s17, 0  ;;  %p1748_p3 = scmp.lt.s32.totalorder %s2181_s17, 2 }
  0x43   : > { %s2747_s19 = smov (%p34_p13, %s32_s19), 0  ;;  %p2350_p7 = por %p2252_p2, %p46_p6 }
  0x44   : > { %p48_p5 = por %p47_p10, %p46_p6  ;;  %s36_s28 = ssub.s32 %s2177_s16, %s2747_s19 }
  0x45   : > { %s2734_s27 = scalar_select %p2350_p7, 1, 0 }
  0x46   : > { %s186_s30 = sand.u32 1, %s2169_s14   ;;  %p37_p9 = scmp.eq.s32.totalorder %s36_s28, 0 }
  0x47   : > { %s1489_s29 = sshll.u32 %s186_s30, 6  ;;  %s1574_s4 = sshll.u32 %s2177_s16, 10 }
  0x48   : > { %s2359_s5 = scalar_select %p37_p9, %s2169_s14, %s39_s25  }
  0x49   : > { %s2364_s8 = scalar_lea.hbm %s2720_s0, %s1574_s4  ;;  %s190_s21 = scalar_lea.vmem [#allocation3], %s1489_s29 }
  0x4a   : > { %s197_s26 = sshll.u32 %s190_s21, 4  ;;  %p2368_p2 = pnand %p1748_p3, %p48_p5  ;;  %s2372_s26 = int_to_ptr.vmem [resolvable:$true] %s197_s26 }
  0x4b   : > { %s2374_s18 = scalar_lea.sflag [#allocation4], %s186_s30  ;;  %s2065_s25 = scalar_lea.hbm %s2364_s8, 1024 }
  0x4c   : > { %p2066_p11 = scmp.ne.s32.totalorder %s2364_s8, %s2065_s25  ;;  %p2067_p12 = pneg %p2368_p2 }
  0x4d   : > { %s2070_s4 = scalar_lea.hbm %s2720_s0, 2048  ;;  %p2071_p4 = scmp.lt.u32.totalorder %s2364_s8, %s2720_s0 }
  0x4e   : > { %p2068_p0 = pnand %p2067_p12, %p2066_p11  ;;  %p2072_p13 = scmp.lt.u32.totalorder %s2070_s4, %s2065_s25 }
  0x4f   : > { %p2074_p10 = scmp.lt.u32.totalorder %s2065_s25, %s2364_s8 }
  0x50   : > { %p2069_p1 = pneg %p2068_p0  ;;  %p2073_p6 = por %p2072_p13, %p2071_p4 }
  0x52   : > { %p2075_p3 = por %p2074_p10, %p2073_p6 }
  0x54   : > { %p2076_p5 = pnand %p2075_p3, %p2069_p1 }
  0x56   : > { %2079 = shalt.err (!%p2076_p5)
}
  0x57   : > { %s2080_s30 = scalar_lea.vmem %s2372_s26, 1024  ;;  %s2189_s21 = smov [#allocation3]  }
  0x58   : > { %p2081_p9 = scmp.ne.s32.totalorder %s2372_s26, %s2080_s30  ;;  %s2085_s28 = sshll.u32 %s2189_s21, 4  ;;  %s2086_s28 = int_to_ptr.vmem [resolvable:$false] %s2085_s28 }
  0x59   : > { %s2087_s29 = scalar_lea.vmem %s2086_s28, 2048  ;;  %p2088_p7 = scmp.lt.s32.totalorder %s2372_s26, %s2086_s28 }
  0x5a   : > { %p2083_p11 = pnand %p2081_p9, %p2067_p12  ;;  %p2089_p4 = scmp.lt.s32.totalorder %s2087_s29, %s2080_s30 }
  0x5c   : > { %p2084_p0 = pneg %p2083_p11  ;;  %p2090_p13 = por %p2089_p4, %p2088_p7 }
  0x5e   : > { %p2091_p6 = pnand %p2090_p13, %p2084_p0 }
  0x60   : > { %2094 = shalt.err (!%p2091_p6)
}
  0x61   : > { %1741 = dma.hbm_to_vmem [thread:$0]  (!%p2368_p2), %s2364_s8, 1024, %s2372_s26, %s2374_s18, %s2187_s9, %s2187_s9, %s2188_s10  }
  0x62   : > { %209 = sbr.rel (%p2268_p8) target bundleno = 713 (0x2c9), region = 32  ;;  %s2408_s25 = sand.u32 (!%p2268_p8), 1, %s2165_s13  }
  0x63   : > { %s1493_s4 = sshll.u32 (!%p2268_p8), %s2408_s25, 6  ;;  %s212_s6 = scalar_lea.sflag (!%p2268_p8), [#allocation4], %s2408_s25 }
  0x64   : > { %s2414_s11 = scalar_lea.vmem (!%p2268_p8), [#allocation3], %s1493_s4  ;;  %p2736_p7 = scmp.ne.s32.totalorder (!%p2268_p8), %s2730_s22, 0 }
  0x69   : > { %2148 = dma.done.wait (%p2736_p7), %s212_s6, 1024  }
  0x6a   : > { %2150 = vsyncadd (%p2736_p7), %s212_s6, 4294966272  ;;  %p2737_p2 = scmp.ne.s32.totalorder %s2728_s20, 0 }
  0x6c   : > { %2152 = dma.done.wait (%p2737_p2), [#allocation7], 6144  }
  0x6d   : > { %2154 = vsyncadd (%p2737_p2), [#allocation7], 4294961152  ;;  %v2190_v0 = vmov 0   ;;  %v1809_v1 = vld [vmem:[#allocation6 + $0x4] ss:$16 sps:$4 sm:$0xff]   ;;  %v1841_v24 = vld [vmem:[%s2414_s11 + $0x8] sm:$0xff]  }
  0x6e   : > { %559 = vmatprep.mubr.bf16.mxu0 %v2190_v0  ;;  %599 = vmatprep.mubr.bf16.mxu1 %v2190_v0  ;;  %v1811_v2 = vld [vmem:[#allocation6] ss:$16 sps:$4 sm:$0xff]   ;;  %v1812_v3 = vld [vmem:[#allocation6 + $0x24] ss:$16 sps:$4 sm:$0xff]   ;;  %v1837_v19 = vld [vmem:[#allocation6 + $0xc] ss:$16 sps:$4 sm:$0xff]  }
  0x6f   : > { %527 = vmatprep.subr.bf16.mxu0 %v1809_v1  ;;  %1703 = vmatprep.subr.bf16.mxu1 %v1809_v1  ;;  %v1814_v4 = vld [vmem:[#allocation6 + $0x20] ss:$16 sps:$4 sm:$0xff]   ;;  %v1815_v5 = vld [vmem:[#allocation6 + $0x44] ss:$16 sps:$4 sm:$0xff]   ;;  %v1835_v20 = vld [vmem:[#allocation6 + $0x8] ss:$16 sps:$4 sm:$0xff]  }
  0x70   : > { %528 = vmatpush1.bf16.msra.mxu0 %v1811_v2  ;;  %1711 = vmatpush1.bf16.msra.mxu1 %v1811_v2  ;;  %v1817_v6 = vld [vmem:[#allocation6 + $0x40] ss:$16 sps:$4 sm:$0xff]   ;;  %v1818_v7 = vld [vmem:[#allocation6 + $0x64] ss:$16 sps:$4 sm:$0xff]   ;;  %v1840_v21 = vld [vmem:[#allocation6 + $0x2c] ss:$16 sps:$4 sm:$0xff]  }
  0x71   : > { %529 = vmatprep.subr.bf16.mxu0 %v1812_v3  ;;  %1704 = vmatprep.subr.bf16.mxu1 %v1812_v3  ;;  %v1820_v8 = vld [vmem:[#allocation6 + $0x60] ss:$16 sps:$4 sm:$0xff]   ;;  %v1821_v9 = vld [vmem:[#allocation6 + $0x84] ss:$16 sps:$4 sm:$0xff]   ;;  %v1838_v22 = vld [vmem:[#allocation6 + $0x28] ss:$16 sps:$4 sm:$0xff]  }
  0x72   : > { %v1823_v10 = vld [vmem:[#allocation6 + $0x80] ss:$16 sps:$4 sm:$0xff]   ;;  %v1824_v11 = vld [vmem:[#allocation6 + $0xa4] ss:$16 sps:$4 sm:$0xff]   ;;  %v1845_v23 = vld [vmem:[#allocation6 + $0x4c] ss:$16 sps:$4 sm:$0xff]  }
  0x73   : > { %v1826_v12 = vld [vmem:[#allocation6 + $0xa0] ss:$16 sps:$4 sm:$0xff]   ;;  %v1827_v13 = vld [vmem:[#allocation6 + $0xc4] ss:$16 sps:$4 sm:$0xff]   ;;  %v1842_v25 = vld [vmem:[%s2414_s11 + $0x28] sm:$0xff]   ;;  %s2654_s20 = scalar_lea.vmem [#allocation9], %s1493_s4 }
  0x74   : > { %530 = vmatpush1.bf16.msra.mxu0 %v1814_v4  ;;  %1712 = vmatpush1.bf16.msra.mxu1 %v1814_v4  ;;  %v1829_v14 = vld [vmem:[#allocation6 + $0xc0] ss:$16 sps:$4 sm:$0xff]   ;;  %v1830_v15 = vld [vmem:[#allocation6 + $0xe4] ss:$16 sps:$4 sm:$0xff]   ;;  %v1843_v26 = vld [vmem:[#allocation6 + $0x48] ss:$16 sps:$4 sm:$0xff]  }
  0x75   : > { %531 = vmatprep.subr.bf16.mxu0 %v1815_v5  ;;  %1705 = vmatprep.subr.bf16.mxu1 %v1815_v5  ;;  %v1832_v16 = vld [vmem:[#allocation6 + $0xe0] ss:$16 sps:$4 sm:$0xff]   ;;  %v1848_v27 = vld [vmem:[#allocation6 + $0x6c] ss:$16 sps:$4 sm:$0xff]   ;;  %v1846_v28 = vld [vmem:[#allocation6 + $0x68] ss:$16 sps:$4 sm:$0xff]  }
  0x76   : > { %v1833_v17 = vld [vmem:[%s2414_s11] sm:$0xff]   ;;  %v1853_v29 = vld [vmem:[#allocation6 + $0x8c] ss:$16 sps:$4 sm:$0xff]   ;;  %v1849_v30 = vld [vmem:[%s2414_s11 + $0x10] sm:$0xff]   ;;  %s1379_s22 = sshll.u32 %s2654_s20, 4  ;;  %s1591_s24 = sshll.u32 %s2173_s15, 10  ;;  %s2665_s22 = int_to_ptr.vmem [resolvable:$true] %s1379_s22 }
  0x77   : > { %v2428_v18 = vld [vmem:[%s2414_s11 + $0x20] sm:$0xff]   ;;  %v1850_v31 = vld [vmem:[%s2414_s11 + $0x30] sm:$0xff]   ;;  %v1851_v32 = vld [vmem:[#allocation6 + $0x88] ss:$16 sps:$4 sm:$0xff]   ;;  %s2670_s8 = scalar_lea.hbm %s2723_s3, %s1591_s24  ;;  %s1366_s26 = scalar_lea.sflag [#allocation5], %s2408_s25 }
  0x78   : > { %532 = vmatpush1.bf16.msra.mxu0 %v1817_v6  ;;  %1713 = vmatpush1.bf16.msra.mxu1 %v1817_v6  ;;  %v1856_v33 = vld [vmem:[#allocation6 + $0xac] ss:$16 sps:$4 sm:$0xff]   ;;  %v1854_v34 = vld [vmem:[#allocation6 + $0xa8] ss:$16 sps:$4 sm:$0xff]   ;;  %v1865_v41 = vld [vmem:[#allocation8 + $0x40] sm:$0xff]   ;;  %s2095_s18 = scalar_lea.vmem %s2665_s22, 1024 }
  0x79   : > { %533 = vmatprep.subr.bf16.mxu0 %v1818_v7  ;;  %1706 = vmatprep.subr.bf16.mxu1 %v1818_v7  ;;  %v1861_v35 = vld [vmem:[#allocation6 + $0xcc] ss:$16 sps:$4 sm:$0xff]   ;;  %v1859_v38 = vld [vmem:[#allocation6 + $0xc8] ss:$16 sps:$4 sm:$0xff]   ;;  %v1866_v42 = vld [vmem:[#allocation8] sm:$0xff]   ;;  %p2096_p8 = scmp.ne.s32.totalorder %s2665_s22, %s2095_s18  ;;  %p2738_p12 = scmp.ne.s32.totalorder %s2734_s27, 0 }
  0x7a   : > { %v1857_v36 = vld [vmem:[%s2414_s11 + $0x18] sm:$0xff]   ;;  %v1867_v43 = vld [vmem:[#allocation8 + $0x48] sm:$0xff]   ;;  %v1869_v45 = vld [vmem:[#allocation8 + $0x50] sm:$0xff]   ;;  %s2191_s15 = smov [#allocation9]  }
  0x7b   : > { %v1858_v37 = vld [vmem:[%s2414_s11 + $0x38] sm:$0xff]   ;;  %v1868_v44 = vld [vmem:[#allocation8 + $0x8] sm:$0xff]   ;;  %v1870_v46 = vld [vmem:[#allocation8 + $0x10] sm:$0xff]   ;;  %p2097_p1 = pnand %p2096_p8, %p2738_p12  ;;  %s2099_s7 = sshll.u32 %s2191_s15, 4  ;;  %s2100_s7 = int_to_ptr.vmem [resolvable:$false] %s2099_s7 }
  0x7c   : > { %534 = vmatpush1.bf16.msra.mxu0 %v1820_v8  ;;  %1714 = vmatpush1.bf16.msra.mxu1 %v1820_v8  ;;  %v1864_v39 = vld [vmem:[#allocation6 + $0xec] ss:$16 sps:$4 sm:$0xff]   ;;  %v1862_v40 = vld [vmem:[#allocation6 + $0xe8] ss:$16 sps:$4 sm:$0xff]   ;;  %v1873_v49 = vld [vmem:[#allocation8 + $0x60] sm:$0xff]   ;;  %s2101_s30 = scalar_lea.vmem %s2100_s7, 2048  ;;  %p2102_p3 = scmp.lt.s32.totalorder %s2665_s22, %s2100_s7 }
  0x7d   : > { %535 = vmatprep.subr.bf16.mxu0 %v1821_v9  ;;  %1707 = vmatprep.subr.bf16.mxu1 %v1821_v9  ;;  %v1871_v47 = vld [vmem:[#allocation8 + $0x58] sm:$0xff]   ;;  %v1874_v50 = vld [vmem:[#allocation8 + $0x20] sm:$0xff]   ;;  %v1875_v51 = vld [vmem:[#allocation8 + $0x68] sm:$0xff]   ;;  %p2098_p10 = pneg %p2097_p1  ;;  %p2103_p5 = scmp.lt.s32.totalorder %s2101_s30, %s2095_s18 }
  0x7e   : > { %v1872_v48 = vld [vmem:[#allocation8 + $0x18] sm:$0xff]   ;;  %v1876_v52 = vld [vmem:[#allocation8 + $0x28] sm:$0xff]   ;;  %v1877_v53 = vld [vmem:[#allocation8 + $0x70] sm:$0xff]  }
  0x7f   : > { %v1878_v54 = vld [vmem:[#allocation8 + $0x30] sm:$0xff]   ;;  %v1879_v55 = vld [vmem:[#allocation8 + $0x78] sm:$0xff]   ;;  %p2104_p9 = por %p2103_p5, %p2102_p3 }
  0x80   : > { %536 = vmatpush1.bf16.msra.mxu0 %v1823_v10  ;;  %1715 = vmatpush1.bf16.msra.mxu1 %v1823_v10  ;;  %v1880_v56 = vld [vmem:[#allocation8 + $0x38] sm:$0xff]  }
  0x81   : > { %537 = vmatprep.subr.bf16.mxu0 %v1824_v11  ;;  %1708 = vmatprep.subr.bf16.mxu1 %v1824_v11  ;;  %p2105_p11 = pnand %p2104_p9, %p2098_p10 }
  0x84   : > { %538 = vmatpush1.bf16.msra.mxu0 %v1826_v12  ;;  %1716 = vmatpush1.bf16.msra.mxu1 %v1826_v12 }
  0x85   : > { %539 = vmatprep.subr.bf16.mxu0 %v1827_v13  ;;  %1709 = vmatprep.subr.bf16.mxu1 %v1827_v13 }
  0x88   : > { %540 = vmatpush1.bf16.msra.mxu0 %v1829_v14  ;;  %1717 = vmatpush1.bf16.msra.mxu1 %v1829_v14 }
  0x89   : > { %541 = vmatprep.subr.bf16.mxu0 %v1830_v15  ;;  %1710 = vmatprep.subr.bf16.mxu1 %v1830_v15 }
  0x8c   : > { %542 = vmatpush1.bf16.msra.mxu0 %v1832_v16  ;;  %1718 = vmatpush1.bf16.msra.mxu1 %v1832_v16 }
  0x8d   : > { %640 = vmatprep.subr.bf16.mxu1 %v1837_v19  ;;  %1639 = vmatprep.subr.bf16.mxu0 %v1865_v41 }
  0x8f   : > { %560 = vmatmul.mubr.bf16.vlgmr.msra.gmra.mrb[0].mxu0 %v1833_v17  ;;  %600 = vmatmul.mubr.bf16.vlgmr.msra.gmra.mrb[0].mxu1 %v2428_v18 }
  0x90   : > { %641 = vmatpush1.bf16.msra.mxu1 %v1835_v20  ;;  %569 = vmatprep.mubr.bf16.mxu0 %v2190_v0 }
  0x91   : > { %642 = vmatprep.subr.bf16.mxu1 %v1840_v21  ;;  %609 = vmatprep.mubr.bf16.mxu1 %v2190_v0 }
  0x92   : > { %1640 = vmatpush3.bf16.msra.mxu0 %v1866_v42 }
  0x93   : > { %1641 = vmatprep.subr.bf16.mxu0 %v1867_v43 }
  0x94   : > { %643 = vmatpush1.bf16.msra.mxu1 %v1838_v22 }
  0x95   : > { %644 = vmatprep.subr.bf16.mxu1 %v1845_v23 }
  0x96   : > { %1642 = vmatpush3.bf16.msra.mxu0 %v1868_v44 }
  0x97   : > { %570 = vmatmul.mubr.bf16.gmra.mrb[4].mxu0 %v1841_v24  ;;  %610 = vmatmul.mubr.bf16.gmra.mrb[4].mxu1 %v1842_v25 }
  0x98   : > { %645 = vmatpush1.bf16.msra.mxu1 %v1843_v26  ;;  %579 = vmatprep.mubr.bf16.mxu0 %v2190_v0 }
  0x99   : > { %646 = vmatprep.subr.bf16.mxu1 %v1848_v27  ;;  %619 = vmatprep.mubr.bf16.mxu1 %v2190_v0 }
  0x9a   : > { %1643 = vmatprep.subr.bf16.mxu0 %v1869_v45 }
  0x9b   : > { %1644 = vmatpush3.bf16.msra.mxu0 %v1870_v46 }
  0x9c   : > { %647 = vmatpush1.bf16.msra.mxu1 %v1846_v28  ;;  %1645 = vmatprep.subr.bf16.mxu0 %v1871_v47 }
  0x9d   : > { %648 = vmatprep.subr.bf16.mxu1 %v1853_v29 }
  0x9f   : > { %580 = vmatmul.mubr.bf16.gmra.mrb[8].mxu0 %v1849_v30  ;;  %620 = vmatmul.mubr.bf16.gmra.mrb[8].mxu1 %v1850_v31 }
  0xa0   : > { %649 = vmatpush1.bf16.msra.mxu1 %v1851_v32  ;;  %589 = vmatprep.mubr.bf16.mxu0 %v2190_v0 }
  0xa1   : > { %650 = vmatprep.subr.bf16.mxu1 %v1856_v33  ;;  %629 = vmatprep.mubr.bf16.mxu1 %v2190_v0 }
  0xa2   : > { %1646 = vmatpush3.bf16.msra.mxu0 %v1872_v48 }
  0xa3   : > { %1647 = vmatprep.subr.bf16.mxu0 %v1873_v49 }
  0xa4   : > { %651 = vmatpush1.bf16.msra.mxu1 %v1854_v34 }
  0xa5   : > { %652 = vmatprep.subr.bf16.mxu1 %v1861_v35 }
  0xa6   : > { %1648 = vmatpush3.bf16.msra.mxu0 %v1874_v50 }
  0xa7   : > { %590 = vmatmul.mubr.bf16.gmra.mrb[12].mxu0 %v1857_v36  ;;  %630 = vmatmul.mubr.bf16.gmra.mrb[12].mxu1 %v1858_v37 }
  0xa8   : > { %653 = vmatpush1.bf16.msra.mxu1 %v1859_v38  ;;  %672 = vmatprep.mubr.bf16.mxu1 %v2190_v0 }
  0xa9   : > { %654 = vmatprep.subr.bf16.mxu1 %v1864_v39  ;;  %1649 = vmatprep.subr.bf16.mxu0 %v1875_v51 }
  0xaa   : > { %1650 = vmatpush3.bf16.msra.mxu0 %v1876_v52 }
  0xab   : > { %1651 = vmatprep.subr.bf16.mxu0 %v1877_v53 }
  0xac   : > { %655 = vmatpush1.bf16.msra.mxu1 %v1862_v40 }
  0xae   : > { %1652 = vmatpush3.bf16.msra.mxu0 %v1878_v54 }
  0xaf   : > { %673 = vmatmul.mubr.bf16.vlgmr.msra.gmra.mrb[16].mxu1 %v1833_v17  ;;  %1653 = vmatprep.subr.bf16.mxu0 %v1879_v55 }
  0xb0   : > { %682 = vmatprep.mubr.bf16.mxu1 %v2190_v0 }
  0xb2   : > { %1654 = vmatpush3.bf16.msra.mxu0 %v1880_v56 }
  0xb7   : > { %683 = vmatmul.mubr.bf16.gmra.mrb[20].mxu1 %v1841_v24 }
  0xb8   : > { %692 = vmatprep.mubr.bf16.mxu1 %v2190_v0 }
  0xbf   : > { %693 = vmatmul.mubr.bf16.gmra.mrb[24].mxu1 %v1849_v30 }
  0xc0   : > { %702 = vmatprep.mubr.bf16.mxu1 %v2190_v0 }
  0xc7   : > { %703 = vmatmul.mubr.bf16.gmra.mrb[28].mxu1 %v1857_v36 }
  0xc8   : > { %712 = vmatprep.mubr.bf16.mxu1 %v2190_v0 }
  0xcf   : > { %713 = vmatmul.mubr.bf16.gmra.mrb[32].mxu1 %v2428_v18 }
  0xd0   : > { %722 = vmatprep.mubr.bf16.mxu1 %v2190_v0 }
  0xd7   : > { %723 = vmatmul.mubr.bf16.gmra.mrb[36].mxu1 %v1842_v25 }
  0xd8   : > { %732 = vmatprep.mubr.bf16.mxu1 %v2190_v0 }
  0xdf   : > { %733 = vmatmul.mubr.bf16.gmra.mrb[40].mxu1 %v1850_v31 }
  0xe0   : > { %742 = vmatprep.mubr.bf16.mxu1 %v2190_v0 }
  0xe7   : > { %743 = vmatmul.mubr.bf16.gmra.mrb[44].mxu1 %v1858_v37 }
 0x162   : > { %v2452_v57 = vpop.f32.mrb[0].mxu0  ;;  %v2454_v58 = vpop.f32.mrb[0].mxu1 }
 0x163   : > { %v753_v59 = vsub.f32 0.0, %v2452_v57  ;;  %v2457_v60 = vpop.f32.mrb[1].mxu0  ;;  %v2459_v61 = vpop.f32.mrb[1].mxu1  ;;  %v769_v62 = vsub.f32 0.0, %v2454_v58 }
 0x164   : > { %v754_v63 = vsub.f32 0.0, %v2457_v60  ;;  %v2463_v0 = vpop.f32.mrb[2].mxu0  ;;  %v2465_v1 = vpop.f32.mrb[2].mxu1  ;;  %v770_v5 = vsub.f32 0.0, %v2459_v61 }
 0x165   : > { %v785_v2 = vmul.f32 1.442695, %v753_v59  ;;  %v755_v3 = vsub.f32 0.0, %v2463_v0  ;;  %v2469_v6 = vpop.f32.mrb[3].mxu0  ;;  %v2471_v7 = vpop.f32.mrb[3].mxu1  ;;  %v771_v11 = vsub.f32 0.0, %v2465_v1 }
 0x166   : > { %v787_v4 = vmul.f32 1.442695, %v754_v63  ;;  %v756_v9 = vsub.f32 0.0, %v2469_v6  ;;  %v817_v10 = vmul.f32 1.442695, %v769_v62  ;;  %v772_v14 = vsub.f32 0.0, %v2471_v7 }
 0x167   : > { %1881 = vpow2.f32 %v785_v2  ;;  %v789_v8 = vmul.f32 1.442695, %v755_v3  ;;  %v819_v13 = vmul.f32 1.442695, %v770_v5  ;;  %v821_v20 = vmul.f32 1.442695, %v771_v11 }
 0x168   : > { %1883 = vpow2.f32 %v787_v4  ;;  %v791_v12 = vmul.f32 1.442695, %v756_v9  ;;  %v823_v27 = vmul.f32 1.442695, %v772_v14 }
 0x169   : > { %1885 = vpow2.f32 %v789_v8 }
 0x16a   : > { %v2476_v15 = vpop.f32.mrb[4].mxu0  ;;  %v2478_v16 = vpop.f32.mrb[4].mxu1  ;;  %1887 = vpow2.f32 %v817_v10 }
 0x16b   : > { %v757_v17 = vsub.f32 0.0, %v2476_v15  ;;  %v2481_v18 = vpop.f32.mrb[5].mxu0  ;;  %v2483_v19 = vpop.f32.mrb[5].mxu1  ;;  %1889 = vpow2.f32 %v791_v12  ;;  %v773_v32 = vsub.f32 0.0, %v2478_v16 }
 0x16c   : > { %v758_v21 = vsub.f32 0.0, %v2481_v18  ;;  %v2486_v22 = vpop.f32.mrb[6].mxu0  ;;  %v2488_v23 = vpop.f32.mrb[6].mxu1  ;;  %1891 = vpow2.f32 %v819_v13  ;;  %v774_v37 = vsub.f32 0.0, %v2483_v19 }
 0x16d   : > { %v793_v24 = vmul.f32 1.442695, %v757_v17  ;;  %v759_v25 = vsub.f32 0.0, %v2486_v22  ;;  %v2491_v26 = vpop.f32.mrb[7].mxu0  ;;  %v2493_v29 = vpop.f32.mrb[7].mxu1 }
 0x16e   : > { %v795_v28 = vmul.f32 1.442695, %v758_v21  ;;  %v825_v44 = vmul.f32 1.442695, %v773_v32  ;;  %v827_v50 = vmul.f32 1.442695, %v774_v37 }
 0x16f   : > { %1893 = vpow2.f32 %v793_v24  ;;  %v797_v30 = vmul.f32 1.442695, %v759_v25  ;;  %v760_v56 = vsub.f32 0.0, %v2491_v26  ;;  %v776_v37 = vsub.f32 0.0, %v2493_v29 }
 0x170   : > { %1895 = vpow2.f32 %v821_v20 }
 0x171   : > { %v1882_v31 = vpop.eup %1881  ;;  %1897 = vpow2.f32 %v795_v28  ;;  %v799_v21 = vmul.f32 1.442695, %v760_v56  ;;  %v775_v28 = vsub.f32 0.0, %v2488_v23 }
 0x172   : > { %v849_v33 = vadd.f32 1.0, %v1882_v31  ;;  %1899 = vpow2.f32 %v823_v27  ;;  %v2496_v34 = vpop.f32.mrb[8].mxu0  ;;  %v2498_v35 = vpop.f32.mrb[8].mxu1 }
 0x173   : > { %v1884_v36 = vpop.eup %1883  ;;  %1901 = vpow2.f32 %v797_v30  ;;  %v2501_v38 = vpop.f32.mrb[9].mxu0  ;;  %v761_v8 = vsub.f32 0.0, %v2496_v34 }
 0x174   : > { %v2503_v39 = vpop.f32.mrb[9].mxu1  ;;  %1903 = vrcp.f32 %v849_v33  ;;  %v850_v40 = vadd.f32 1.0, %v1884_v36  ;;  %v2505_v41 = vpop.f32.mrb[10].mxu0  ;;  %v762_v24 = vsub.f32 0.0, %v2501_v38 }
 0x175   : > { %v2507_v42 = vpop.f32.mrb[10].mxu1  ;;  %v1886_v43 = vpop.eup %1885  ;;  %v801_v31 = vmul.f32 1.442695, %v761_v8  ;;  %v763_v32 = vsub.f32 0.0, %v2505_v41 }
 0x176   : > { %v2509_v45 = vpop.f32.mrb[11].mxu0  ;;  %v1888_v46 = vpop.eup %1887  ;;  %1905 = vrcp.f32 %v850_v40  ;;  %v851_v47 = vadd.f32 1.0, %v1886_v43 }
 0x177   : > { %v2511_v48 = vpop.f32.mrb[11].mxu1  ;;  %v1890_v49 = vpop.eup %1889  ;;  %v865_v63 = vadd.f32 1.0, %v1888_v46  ;;  %v764_v46 = vsub.f32 0.0, %v2509_v45 }
 0x178   : > { %v1892_v51 = vpop.eup %1891  ;;  %1907 = vrcp.f32 %v851_v47  ;;  %v852_v52 = vadd.f32 1.0, %v1890_v49 }
 0x179   : > { %v1894_v53 = vpop.eup %1893  ;;  %1909 = vpow2.f32 %v825_v44  ;;  %v866_v12 = vadd.f32 1.0, %v1892_v51  ;;  %v803_v44 = vmul.f32 1.442695, %v762_v24  ;;  %v829_v51 = vmul.f32 1.442695, %v775_v28 }
 0x17a   : > { %v1896_v54 = vpop.eup %1895  ;;  %1911 = vrcp.f32 %v852_v52  ;;  %v853_v55 = vadd.f32 1.0, %v1894_v53  ;;  %v2514_v59 = vpop.f32.mrb[12].mxu0 }
 0x17b   : > { %v1898_v62 = vpop.eup %1897  ;;  %1913 = vpow2.f32 %v827_v50  ;;  %v2516_v2 = vpop.f32.mrb[12].mxu1  ;;  %v867_v27 = vadd.f32 1.0, %v1896_v54  ;;  %v805_v54 = vmul.f32 1.442695, %v763_v32 }
 0x17c   : > { %v2518_v3 = vpop.f32.mrb[13].mxu0  ;;  %v1900_v4 = vpop.eup %1899  ;;  %1915 = vrcp.f32 %v853_v55  ;;  %v854_v5 = vadd.f32 1.0, %v1898_v62  ;;  %v765_v55 = vsub.f32 0.0, %v2514_v59 }
 0x17d   : > { %v2521_v9 = vpop.f32.mrb[13].mxu1  ;;  %v2523_v10 = vpop.f32.mrb[14].mxu0  ;;  %v868_v36 = vadd.f32 1.0, %v1900_v4  ;;  %v831_v4 = vmul.f32 1.442695, %v776_v37 }
 0x17e   : > { %v1902_v11 = vpop.eup %1901  ;;  %v2525_v13 = vpop.f32.mrb[14].mxu1  ;;  %1917 = vrcp.f32 %v854_v5  ;;  %v809_v28 = vmul.f32 1.442695, %v765_v55 }
 0x17f   : > { %v2527_v14 = vpop.f32.mrb[15].mxu0  ;;  %v1904_v17 = vpop.eup %1903  ;;  %v855_v20 = vadd.f32 1.0, %v1902_v11  ;;  %1919 = vrcp.f32 %v865_v63 }
 0x180   : > { %v2530_v25 = vpop.f32.mrb[15].mxu1  ;;  %v1906_v30 = vpop.eup %1905  ;;  %v913_v33 = vmul.f32 %v1904_v17, %v2452_v57 }
 0x181   : > { %1921 = vrcp.f32 %v855_v20  ;;  %v914_v43 = vmul.f32 %v1906_v30, %v2457_v60 }
 0x182   : > { %1923 = vrcp.f32 %v866_v12  ;;  %v1908_v40 = vpop.eup %1907  ;;  %v674_v47 = vpop.f32.mrb[16].mxu1  ;;  %v807_v12 = vmul.f32 1.442695, %v764_v46 }
 0x183   : > { %1925 = vpow2.f32 %v799_v21  ;;  %v1910_v49 = vpop.eup %1909  ;;  %v915_v50 = vmul.f32 %v1908_v40, %v2463_v0  ;;  %v945_v52 = vmul.f32 %v913_v33, %v674_v47  ;;  %v676_v53 = vpop.f32.mrb[17].mxu1  ;;  %v777_v0 = vsub.f32 0.0, %v2498_v35 }
 0x184   : > { %1927 = vrcp.f32 %v867_v27  ;;  %v1912_v57 = vpop.eup %1911  ;;  %v946_v56 = vmul.f32 %v914_v43, %v676_v53  ;;  %v678_v62 = vpop.f32.mrb[18].mxu1  ;;  %v869_v17 = vadd.f32 1.0, %v1910_v49  ;;  %v778_v27 = vsub.f32 0.0, %v2503_v39 }
 0x185   : > { %1929 = vpow2.f32 %v801_v31  ;;  %v1914_v60 = vpop.eup %1913  ;;  %v916_v63 = vmul.f32 %v1912_v57, %v2469_v6  ;;  %v947_v5 = vmul.f32 %v915_v50, %v678_v62  ;;  %v680_v8 = vpop.f32.mrb[19].mxu1  ;;  %v833_v37 = vmul.f32 1.442695, %v777_v0 }
 0x186   : > { %1931 = vrcp.f32 %v868_v36  ;;  %v1916_v11 = vpop.eup %1915  ;;  %v870_v31 = vadd.f32 1.0, %v1914_v60  ;;  %v779_v40 = vsub.f32 0.0, %v2507_v42  ;;  %v835_v50 = vmul.f32 1.442695, %v778_v27 }
 0x187   : > { %1933 = vpow2.f32 %v803_v44  ;;  %v993_v20 = vpack.c.bf16 %v947_v5, %v945_v52  ;;  %v948_v21 = vmul.f32 %v916_v63, %v680_v8  ;;  %v917_v6 = vmul.f32 %v1916_v11, %v2476_v15 }
 0x188   : > { %1935 = vpow2.f32 %v829_v51  ;;  %v1918_v24 = vpop.eup %1917  ;;  %v780_v51 = vsub.f32 0.0, %v2511_v48  ;;  %v781_v62 = vsub.f32 0.0, %v2516_v2  ;;  %v766_v27 = vsub.f32 0.0, %v2518_v3 }
 0x189   : > { %1937 = vpow2.f32 %v805_v54  ;;  %v2543_v30 = vpop.eup %1919  ;;  %v994_v32 = vpack.c.bf16 %v948_v21, %v946_v56  ;;  %v918_v36 = vmul.f32 %v1918_v24, %v2481_v18  ;;  %v837_v56 = vmul.f32 1.442695, %v779_v40 }
 0x18a   : > { %1939 = vpow2.f32 %v831_v4  ;;  %v684_v43 = vpop.f32.mrb[20].mxu1  ;;  %v839_v8 = vmul.f32 1.442695, %v780_v51  ;;  %v767_v40 = vsub.f32 0.0, %v2523_v10 }
 0x18b   : > { %v1922_v33 = vpop.eup %1921  ;;  %1941 = vpow2.f32 %v807_v12  ;;  %v2551_v47 = vmul.f32 %v917_v6, %v684_v43  ;;  %1169 = vmatprep.mubr.bf16.mxu0 %v994_v32  ;;  %v686_v15 = vpop.f32.mrb[21].mxu1  ;;  %v782_v32 = vsub.f32 0.0, %v2521_v9 }
 0x18c   : > { %v2548_v44 = vpop.eup %1923  ;;  %1943 = vrcp.f32 %v869_v17  ;;  %v919_v46 = vmul.f32 %v1922_v33, %v2486_v22  ;;  %v2554_v18 = vmul.f32 %v918_v36, %v686_v15  ;;  %1170 = vmatmul.mubr.bf16.vlgmr.msra.gmra.mrb[16].mxu0 %v993_v20  ;;  %v688_v52 = vpop.f32.mrb[22].mxu1  ;;  %v841_v17 = vmul.f32 1.442695, %v781_v62 }
 0x18d   : > { %v1926_v49 = vpop.eup %1925  ;;  %1945 = vpow2.f32 %v809_v28  ;;  %v2560_v22 = vpop.f32.mrb[23].mxu1  ;;  %v784_v62 = vsub.f32 0.0, %v2530_v25 }
 0x18e   : > { %v2556_v53 = vpop.eup %1927  ;;  %1947 = vrcp.f32 %v870_v31  ;;  %v856_v57 = vadd.f32 1.0, %v1926_v49  ;;  %v2558_v54 = vmul.f32 %v919_v46, %v688_v52  ;;  %v783_v49 = vsub.f32 0.0, %v2525_v13 }
 0x18f   : > { %v1930_v55 = vpop.eup %1929  ;;  %1949 = vpow2.f32 %v833_v37  ;;  %v811_v52 = vmul.f32 1.442695, %v766_v27 }
 0x190   : > { %v2563_v60 = vpop.eup %1931  ;;  %1951 = vrcp.f32 %v856_v57  ;;  %v857_v63 = vadd.f32 1.0, %v1930_v55  ;;  %v995_v4 = vpack.c.bf16 %v2558_v54, %v2551_v47  ;;  %v768_v57 = vsub.f32 0.0, %v2527_v14 }
 0x191   : > { %v1934_v5 = vpop.eup %1933  ;;  %1953 = vpow2.f32 %v835_v50 }
 0x192   : > { %v1936_v11 = vpop.eup %1935  ;;  %1955 = vrcp.f32 %v857_v63  ;;  %v858_v0 = vadd.f32 1.0, %v1934_v5  ;;  %v694_v20 = vpop.f32.mrb[24].mxu1  ;;  %v813_v5 = vmul.f32 1.442695, %v767_v40 }
 0x193   : > { %v1938_v12 = vpop.eup %1937  ;;  %1957 = vpow2.f32 %v837_v56  ;;  %v696_v28 = vpop.f32.mrb[25].mxu1  ;;  %v871_v31 = vadd.f32 1.0, %v1936_v11  ;;  %v843_v56 = vmul.f32 1.442695, %v782_v32 }
 0x194   : > { %v1940_v21 = vpop.eup %1939  ;;  %1959 = vrcp.f32 %v858_v0  ;;  %v859_v24 = vadd.f32 1.0, %v1938_v12  ;;  %v2569_v33 = vpop.f32.mrb[26].mxu1  ;;  %v845_v0 = vmul.f32 1.442695, %v783_v49 }
 0x195   : > { %v1942_v6 = vpop.eup %1941  ;;  %1961 = vpow2.f32 %v839_v8  ;;  %v2574_v43 = vpop.f32.mrb[27].mxu1  ;;  %v872_v15 = vadd.f32 1.0, %v1940_v21  ;;  %v815_v21 = vmul.f32 1.442695, %v768_v57 }
 0x196   : > { %v2571_v36 = vpop.eup %1943  ;;  %1963 = vrcp.f32 %v859_v24  ;;  %v860_v37 = vadd.f32 1.0, %v1942_v6 }
 0x197   : > { %v1946_v46 = vpop.eup %1945  ;;  %1965 = vpow2.f32 %v841_v17 }
 0x198   : > { %v2577_v50 = vpop.eup %1947  ;;  %1967 = vrcp.f32 %v860_v37  ;;  %v861_v51 = vadd.f32 1.0, %v1946_v46 }
 0x199   : > { %v1950_v55 = vpop.eup %1949  ;;  %1969 = vrcp.f32 %v871_v31  ;;  %v847_v31 = vmul.f32 1.442695, %v784_v62 }
 0x19a   : > { %v1952_v63 = vpop.eup %1951  ;;  %1971 = vrcp.f32 %v861_v51  ;;  %v704_v12 = vpop.f32.mrb[28].mxu1  ;;  %v873_v46 = vadd.f32 1.0, %v1950_v55 }
 0x19b   : > { %v1954_v8 = vpop.eup %1953  ;;  %v920_v11 = vmul.f32 %v1952_v63, %v2491_v26  ;;  %1973 = vrcp.f32 %v872_v15  ;;  %v2582_v24 = vpop.f32.mrb[29].mxu1  ;;  %v929_v63 = vmul.f32 %v2543_v30, %v2454_v58  ;;  %v932_v58 = vmul.f32 %v2563_v60, %v2471_v7 }
 0x19c   : > { %v1956_v17 = vpop.eup %1955  ;;  %1975 = vpow2.f32 %v811_v52  ;;  %v2586_v37 = vpop.f32.mrb[30].mxu1 }
 0x19d   : > { %v1958_v27 = vpop.eup %1957  ;;  %v921_v6 = vmul.f32 %v1956_v17, %v2496_v34  ;;  %1977 = vpow2.f32 %v843_v56  ;;  %v952_v32 = vmul.f32 %v920_v11, %v2560_v22  ;;  %v2588_v26 = vpop.f32.mrb[31].mxu1  ;;  %v874_v34 = vadd.f32 1.0, %v1954_v8 }
 0x19e   : > { %v1960_v40 = vpop.eup %1959  ;;  %1979 = vpow2.f32 %v813_v5  ;;  %v875_v5 = vadd.f32 1.0, %v1958_v27 }
 0x19f   : > { %v1962_v15 = vpop.eup %1961  ;;  %v922_v49 = vmul.f32 %v1960_v40, %v2501_v38  ;;  %1981 = vpow2.f32 %v845_v0  ;;  %v996_v51 = vpack.c.bf16 %v952_v32, %v2554_v18  ;;  %v953_v52 = vmul.f32 %v921_v6, %v694_v20 }
 0x1a0   : > { %v1964_v57 = vpop.eup %1963  ;;  %1983 = vpow2.f32 %v815_v21  ;;  %v930_v38 = vmul.f32 %v2548_v44, %v2459_v61  ;;  %v931_v20 = vmul.f32 %v2556_v53, %v2465_v1  ;;  %v876_v61 = vadd.f32 1.0, %v1962_v15 }
 0x1a1   : > { %v1966_v56 = vpop.eup %1965  ;;  %v923_v22 = vmul.f32 %v1964_v57, %v2505_v41  ;;  %1985 = vpow2.f32 %v847_v31  ;;  %1177 = vmatprep.mubr.bf16.mxu0 %v996_v51  ;;  %v954_v62 = vmul.f32 %v922_v49, %v696_v28 }
 0x1a2   : > { %v1968_v55 = vpop.eup %1967  ;;  %1178 = vmatmul.mubr.bf16.gmra.mrb[20].mxu0 %v995_v4  ;;  %1987 = vrcp.f32 %v873_v46  ;;  %v714_v8 = vpop.f32.mrb[32].mxu1 }
 0x1a3   : > { %v1970_v18 = vpop.eup %1969  ;;  %v924_v41 = vmul.f32 %v1968_v55, %v2509_v45  ;;  %v955_v28 = vmul.f32 %v923_v22, %v2569_v33  ;;  %1989 = vrcp.f32 %v874_v34  ;;  %v2606_v30 = vmul.f32 %v929_v63, %v714_v8  ;;  %v716_v44 = vpop.f32.mrb[33].mxu1 }
 0x1a4   : > { %v1972_v11 = vpop.eup %1971  ;;  %v2610_v53 = vmul.f32 %v930_v38, %v716_v44  ;;  %v718_v45 = vpop.f32.mrb[34].mxu1  ;;  %1991 = vrcp.f32 %v875_v5  ;;  %v935_v22 = vmul.f32 %v1970_v18, %v2488_v23 }
 0x1a5   : > { %v1974_v47 = vpop.eup %1973  ;;  %v925_v54 = vmul.f32 %v1972_v11, %v2514_v59  ;;  %v997_v4 = vpack.c.bf16 %v955_v28, %v953_v52  ;;  %v956_v1 = vmul.f32 %v924_v41, %v2574_v43  ;;  %v2612_v0 = vmul.f32 %v931_v20, %v718_v45  ;;  %v720_v17 = vpop.f32.mrb[35].mxu1 }
 0x1a6   : > { %v1976_v33 = vpop.eup %1975  ;;  %v2616_v6 = vmul.f32 %v932_v58, %v720_v17  ;;  %1993 = vrcp.f32 %v876_v61  ;;  %v877_v59 = vadd.f32 1.0, %v1966_v56  ;;  %v934_v52 = vmul.f32 %v2577_v50, %v2483_v19 }
 0x1a7   : > { %v1978_v7 = vpop.eup %1977  ;;  %v862_v60 = vadd.f32 1.0, %v1976_v33  ;;  %v998_v21 = vpack.c.bf16 %v956_v1, %v954_v62  ;;  %v2614_v27 = vmul.f32 %v925_v54, %v704_v12  ;;  %v1001_v43 = vpack.c.bf16 %v2612_v0, %v2606_v30 }
 0x1a8   : > { %v1980_v31 = vpop.eup %1979  ;;  %v1002_v46 = vpack.c.bf16 %v2616_v6, %v2610_v53  ;;  %v933_v12 = vmul.f32 %v2571_v36, %v2478_v16  ;;  %v878_v49 = vadd.f32 1.0, %v1978_v7  ;;  %v936_v16 = vmul.f32 %v1974_v47, %v2493_v29 }
 0x1a9   : > { %v1982_v32 = vpop.eup %1981  ;;  %1995 = vrcp.f32 %v862_v60  ;;  %v863_v40 = vadd.f32 1.0, %v1980_v31  ;;  %1185 = vmatprep.mubr.bf16.mxu0 %v998_v21 }
 0x1aa   : > { %v1984_v15 = vpop.eup %1983  ;;  %1186 = vmatmul.mubr.bf16.gmra.mrb[24].mxu0 %v997_v4  ;;  %v879_v57 = vadd.f32 1.0, %v1982_v32  ;;  %v724_v56 = vpop.f32.mrb[36].mxu1 }
 0x1ab   : > { %v1986_v51 = vpop.eup %1985  ;;  %1997 = vrcp.f32 %v863_v40  ;;  %v864_v34 = vadd.f32 1.0, %v1984_v15  ;;  %v2627_v55 = vmul.f32 %v933_v12, %v724_v56  ;;  %v726_v63 = vpop.f32.mrb[37].mxu1 }
 0x1ac   : > { %1999 = vrcp.f32 %v877_v59  ;;  %v880_v62 = vadd.f32 1.0, %v1986_v51  ;;  %v1988_v38 = vpop.eup %1987  ;;  %v966_v36 = vmul.f32 %v934_v52, %v726_v63  ;;  %v728_v5 = vpop.f32.mrb[38].mxu1 }
 0x1ad   : > { %2001 = vrcp.f32 %v864_v34  ;;  %v1990_v20 = vpop.eup %1989  ;;  %v967_v19 = vmul.f32 %v935_v22, %v728_v5  ;;  %v730_v50 = vpop.f32.mrb[39].mxu1  ;;  %v937_v11 = vmul.f32 %v1988_v38, %v2498_v35 }
 0x1ae   : > { %2003 = vrcp.f32 %v878_v49  ;;  %v968_v41 = vmul.f32 %v936_v16, %v730_v50  ;;  %v1992_v28 = vpop.eup %1991  ;;  %v938_v29 = vmul.f32 %v1990_v20, %v2503_v39 }
 0x1af   : > { %2005 = vrcp.f32 %v879_v57  ;;  %v1003_v23 = vpack.c.bf16 %v967_v19, %v2627_v55  ;;  %v939_v44 = vmul.f32 %v1992_v28, %v2507_v42 }
 0x1b0   : > { %2007 = vrcp.f32 %v880_v62  ;;  %v1004_v18 = vpack.c.bf16 %v968_v41, %v966_v36  ;;  %v1994_v8 = vpop.eup %1993 }
 0x1b1   : > { %v940_v45 = vmul.f32 %v1994_v8, %v2511_v48 }
 0x1b2   : > { %v734_v61 = vpop.f32.mrb[40].mxu1 }
 0x1b3   : > { %v1996_v58 = vpop.eup %1995  ;;  %v969_v54 = vmul.f32 %v937_v11, %v734_v61  ;;  %v736_v4 = vpop.f32.mrb[41].mxu1 }
 0x1b4   : > { %v926_v47 = vmul.f32 %v1996_v58, %v2518_v3  ;;  %v970_v33 = vmul.f32 %v938_v29, %v736_v4  ;;  %v738_v17 = vpop.f32.mrb[42].mxu1 }
 0x1b5   : > { %v1998_v1 = vpop.eup %1997  ;;  %v971_v21 = vmul.f32 %v939_v44, %v738_v17  ;;  %v740_v31 = vpop.f32.mrb[43].mxu1 }
 0x1b6   : > { %v2000_v7 = vpop.eup %1999  ;;  %v927_v60 = vmul.f32 %v1998_v1, %v2523_v10  ;;  %v958_v35 = vmul.f32 %v926_v47, %v2582_v24  ;;  %v972_v59 = vmul.f32 %v940_v45, %v740_v31 }
 0x1b7   : > { %v2002_v39 = vpop.eup %2001  ;;  %v1005_v40 = vpack.c.bf16 %v971_v21, %v969_v54  ;;  %v941_v49 = vmul.f32 %v2000_v7, %v2516_v2 }
 0x1b8   : > { %v2004_v32 = vpop.eup %2003  ;;  %v928_v42 = vmul.f32 %v2002_v39, %v2527_v14  ;;  %v959_v3 = vmul.f32 %v927_v60, %v2586_v37  ;;  %v1006_v12 = vpack.c.bf16 %v972_v59, %v970_v33 }
 0x1b9   : > { %v2006_v15 = vpop.eup %2005  ;;  %v942_v24 = vmul.f32 %v2004_v32, %v2521_v9 }
 0x1ba   : > { %v2008_v48 = vpop.eup %2007  ;;  %v999_v51 = vpack.c.bf16 %v959_v3, %v2614_v27  ;;  %v960_v10 = vmul.f32 %v928_v42, %v2588_v26  ;;  %v744_v52 = vpop.f32.mrb[44].mxu1  ;;  %v943_v57 = vmul.f32 %v2006_v15, %v2525_v13 }
 0x1bb   : > { %v973_v56 = vmul.f32 %v941_v49, %v744_v52  ;;  %v746_v14 = vpop.f32.mrb[45].mxu1  ;;  %v944_v37 = vmul.f32 %v2008_v48, %v2530_v25 }
 0x1bc   : > { %v1000_v34 = vpack.c.bf16 %v960_v10, %v958_v35  ;;  %v974_v22 = vmul.f32 %v942_v24, %v746_v14  ;;  %v748_v62 = vpop.f32.mrb[46].mxu1 }
 0x1bd   : > { %v975_v55 = vmul.f32 %v943_v57, %v748_v62  ;;  %v750_v63 = vpop.f32.mrb[47].mxu1 }
 0x1be   : > { %1193 = vmatprep.mubr.bf16.mxu0 %v1000_v34  ;;  %v976_v2 = vmul.f32 %v944_v37, %v750_v63 }
 0x1bf   : > { %1194 = vmatmul.mubr.bf16.gmra.mrb[28].mxu0 %v999_v51  ;;  %v1007_v9 = vpack.c.bf16 %v975_v55, %v973_v56 }
 0x1c0   : > { %1201 = vmatprep.mubr.bf16.mxu0 %v1002_v46  ;;  %v1008_v26 = vpack.c.bf16 %v976_v2, %v974_v22 }
 0x1c7   : > { %1202 = vmatmul.mubr.bf16.gmra.mrb[32].mxu0 %v1001_v43 }
 0x1c8   : > { %1209 = vmatprep.mubr.bf16.mxu0 %v1004_v18 }
 0x1cf   : > { %1210 = vmatmul.mubr.bf16.gmra.mrb[36].mxu0 %v1003_v23 }
 0x1d0   : > { %1217 = vmatprep.mubr.bf16.mxu0 %v1006_v12 }
 0x1d7   : > { %1218 = vmatmul.mubr.bf16.gmra.mrb[40].mxu0 %v1005_v40 }
 0x1d8   : > { %1225 = vmatprep.mubr.bf16.mxu0 %v1008_v26 }
 0x1df   : > { %1226 = vmatmul.mubr.bf16.gmra.mrb[44].mxu0 %v1007_v9 }
 0x25f   : > { %v1655_v13 = vpop.f32.mrb[16].mxu0 }
 0x260   : > { %v1656_v25 = vpop.f32.mrb[17].mxu0 }
 0x261   : > { %v1657_v27 = vadd.f32 %v1656_v25, %v1655_v13  ;;  %v1658_v38 = vpop.f32.mrb[18].mxu0 }
 0x262   : > { %v1659_v16 = vpop.f32.mrb[19].mxu0 }
 0x263   : > { %v1660_v53 = vadd.f32 %v1659_v16, %v1658_v38 }
 0x265   : > { %v1595_v6 = vpack.c.bf16 %v1660_v53, %v1657_v27 }
 0x267   : > { %1596 = vst [vmem:[%s2654_s20] sm:$0xff] %v1595_v6  }
 0x275   : > { %v1661_v30 = vpop.f32.mrb[20].mxu0 }
 0x276   : > { %v1662_v0 = vpop.f32.mrb[21].mxu0 }
 0x277   : > { %v1663_v43 = vadd.f32 %v1662_v0, %v1661_v30  ;;  %v1664_v46 = vpop.f32.mrb[22].mxu0 }
 0x278   : > { %v1665_v36 = vpop.f32.mrb[23].mxu0 }
 0x279   : > { %v1666_v5 = vadd.f32 %v1665_v36, %v1664_v46 }
 0x27b   : > { %v1600_v20 = vpack.c.bf16 %v1666_v5, %v1663_v43 }
 0x27d   : > { %1632 = vst [vmem:[%s2654_s20 + $0x8] sm:$0xff] %v1600_v20   ;;  %v1667_v19 = vpop.f32.mrb[24].mxu0 }
 0x27e   : > { %v1668_v50 = vpop.f32.mrb[25].mxu0 }
 0x27f   : > { %v1669_v41 = vadd.f32 %v1668_v50, %v1667_v19  ;;  %v1670_v28 = vpop.f32.mrb[26].mxu0 }
 0x280   : > { %v1671_v23 = vpop.f32.mrb[27].mxu0 }
 0x281   : > { %v1672_v18 = vadd.f32 %v1671_v23, %v1670_v28 }
 0x283   : > { %v1605_v8 = vpack.c.bf16 %v1672_v18, %v1669_v41 }
 0x285   : > { %1633 = vst [vmem:[%s2654_s20 + $0x10] sm:$0xff] %v1605_v8  }
 0x292   : > { %v1673_v11 = vpop.f32.mrb[28].mxu0 }
 0x293   : > { %v1674_v58 = vpop.f32.mrb[29].mxu0 }
 0x294   : > { %v1675_v29 = vadd.f32 %v1674_v58, %v1673_v11  ;;  %v1676_v61 = vpop.f32.mrb[30].mxu0 }
 0x295   : > { %v1677_v44 = vpop.f32.mrb[31].mxu0 }
 0x296   : > { %v1678_v47 = vadd.f32 %v1677_v44, %v1676_v61 }
 0x298   : > { %v1610_v54 = vpack.c.bf16 %v1678_v47, %v1675_v29 }
 0x29a   : > { %1634 = vst [vmem:[%s2654_s20 + $0x18] sm:$0xff] %v1610_v54   ;;  %v1679_v4 = vpop.f32.mrb[32].mxu0 }
 0x29b   : > { %v1680_v1 = vpop.f32.mrb[33].mxu0 }
 0x29c   : > { %v1681_v45 = vadd.f32 %v1680_v1, %v1679_v4  ;;  %v1682_v33 = vpop.f32.mrb[34].mxu0 }
 0x29d   : > { %v1683_v17 = vpop.f32.mrb[35].mxu0 }
 0x29e   : > { %v1684_v7 = vadd.f32 %v1683_v17, %v1682_v33 }
 0x2a0   : > { %v1615_v60 = vpack.c.bf16 %v1684_v7, %v1681_v45 }
 0x2a2   : > { %1635 = vst [vmem:[%s2654_s20 + $0x20] sm:$0xff] %v1615_v60   ;;  %v1685_v35 = vpop.f32.mrb[36].mxu0 }
 0x2a3   : > { %v1686_v21 = vpop.f32.mrb[37].mxu0 }
 0x2a4   : > { %v1687_v31 = vadd.f32 %v1686_v21, %v1685_v35  ;;  %v1688_v39 = vpop.f32.mrb[38].mxu0 }
 0x2a5   : > { %v1689_v59 = vpop.f32.mrb[39].mxu0 }
 0x2a6   : > { %v1690_v32 = vadd.f32 %v1689_v59, %v1688_v39 }
 0x2a8   : > { %v1620_v42 = vpack.c.bf16 %v1690_v32, %v1687_v31 }
 0x2aa   : > { %1636 = vst [vmem:[%s2654_s20 + $0x28] sm:$0xff] %v1620_v42   ;;  %v1691_v3 = vpop.f32.mrb[40].mxu0 }
 0x2ab   : > { %v1692_v40 = vpop.f32.mrb[41].mxu0 }
 0x2ac   : > { %v1693_v15 = vadd.f32 %v1692_v40, %v1691_v3  ;;  %v1694_v12 = vpop.f32.mrb[42].mxu0 }
 0x2ad   : > { %v1695_v48 = vpop.f32.mrb[43].mxu0 }
 0x2ae   : > { %v1696_v49 = vadd.f32 %v1695_v48, %v1694_v12 }
 0x2b0   : > { %v1625_v51 = vpack.c.bf16 %v1696_v49, %v1693_v15 }
 0x2b2   : > { %1637 = vst [vmem:[%s2654_s20 + $0x30] sm:$0xff] %v1625_v51   ;;  %v1697_v10 = vpop.f32.mrb[44].mxu0 }
 0x2b3   : > { %v1698_v24 = vpop.f32.mrb[45].mxu0 }
 0x2b4   : > { %v1699_v52 = vadd.f32 %v1698_v24, %v1697_v10  ;;  %v1700_v57 = vpop.f32.mrb[46].mxu0 }
 0x2b5   : > { %v1701_v34 = vpop.f32.mrb[47].mxu0 }
 0x2b6   : > { %v1702_v56 = vadd.f32 %v1701_v34, %v1700_v57 }
 0x2b8   : > { %v1630_v14 = vpack.c.bf16 %v1702_v56, %v1699_v52 }
 0x2ba   : > { %1638 = vst [vmem:[%s2654_s20 + $0x38] sm:$0xff] %v1630_v14  }
 0x2bb   : > { %2108 = shalt.err (!%p2105_p11)
}
 0x2bc   : > { %s2109_s21 = scalar_lea.hbm %s2670_s8, 1024  ;;  %s2113_s4 = scalar_lea.hbm %s2723_s3, 2048 }
 0x2bd   : > { %p2110_p0 = scmp.ne.s32.totalorder %s2670_s8, %s2109_s21  ;;  %p2114_p6 = scmp.lt.u32.totalorder %s2670_s8, %s2723_s3 }
 0x2be   : > { %p2115_p7 = scmp.lt.u32.totalorder %s2113_s4, %s2109_s21  ;;  %p2117_p8 = scmp.lt.u32.totalorder %s2109_s21, %s2670_s8 }
 0x2bf   : > { %p2111_p4 = pnand %p2110_p0, %p2738_p12 }
 0x2c0   : > { %p2116_p2 = por %p2115_p7, %p2114_p6 }
 0x2c1   : > { %p2112_p13 = pneg %p2111_p4 }
 0x2c2   : > { %p2118_p1 = por %p2117_p8, %p2116_p2 }
 0x2c4   : > { %p2119_p10 = pnand %p2118_p1, %p2112_p13 }
 0x2c6   : > { %2122 = shalt.err (!%p2119_p10)
}
 0x2c7   : > { %s2192_s20 = smov 64   ;;  %s2193_s24 = smov 4  }
 0x2c8   : > { %1729 = dma.vmem_to_hbm [thread:$0]  (%p2738_p12), %s2665_s22, 1024, %s2670_s8, %s1366_s26, %s2192_s20, %s2192_s20, %s2193_s24  }
 0x2c9 PF: > { %s1394_s9 = sand.u32 1, %s2161_s12   ;;  %p2739_p3 = scmp.ne.s32.totalorder %s2731_s23, 0 }
 0x2ca   : > { %p2740_p5 = scmp.ge.s32.totalorder %s2181_s17, 2  ;;  %s1395_s10 = scalar_lea.sflag [#allocation5], %s1394_s9 }
 0x2cc   : > { %p1743_p9 = pnand %p2740_p5, %p2739_p3 }
 0x2ce   : > { %2156 = dma.done.wait (!%p1743_p9), %s1395_s10, 1024  }
 0x2cf   : > { %2158 = vsyncadd (!%p1743_p9), %s1395_s10, 4294966272  ;;  %s20_s17 = sadd.s32 1, %s2181_s17   ;;  %s2741_s12 = smov %s2165_s13 }
 0x2d0   : > { %p17_p11 = scmp.ge.s32.totalorder %s20_s17, 4   ;;  %s2742_s13 = smov %s2169_s14 }
 0x2d1   : > { %s2743_s14 = smov %s2359_s5  ;;  %s2744_s15 = smov %s2177_s16 }
 0x2d2   : > { %s2745_s16 = smov %s2747_s19  ;;  %19 = sbr.rel (!%p17_p11) target bundleno = 7 (0x7), region = 95 }
 0x2d9   :  { %1400 = vsyncpa [#allocation4], 1 }
 0x2da   :  { %1402 = vsyncpa [#allocation4 + $0x1], 1 }
 0x2db   :  { %1403 = vsyncpa [#allocation7], 1 }
 0x2dc   :  { %1404 = vsyncpa [#allocation5], 1 }
 0x2dd   :  { %1406 = vsyncpa [#allocation5 + $0x1], 1 }

</bundles_post_ra>
